<compile_context>
chip_gen: v5e
topology: v5e:2x2
jax: 0.10.0
libtpu: 0.0.40
codegen_flags: <defaults>
</compile_context>

<pallas_src>
import jax
import jax.numpy as jnp
from jax.experimental import pallas as pl
from jax.experimental.pallas import tpu as pltpu

_LANE = 128
_TM_GRAN = 16                      # bf16: 2 rows per sublane -> TM multiple of 16
_TM_CAP = 1024                     # largest batch tile ever used
_SPLIT_MIN_B = 256                 # force >= 2 grid steps above this (v7x megacore)
_VMEM_BUDGET = 40 * 1024 * 1024    # sizing budget, safe on v7x's 64 MiB VMEM
_VMEM_LIMIT_CAP = 48 * 1024 * 1024 # never request more than this


def _round_up(x, m):
    return ((x + m - 1) // m) * m


def _cdiv(a, b):
    return -(-a // b)


def decoder_y_kernel(w_ref, w1_ref, b1_ref, w2_ref, b2_ref, w3_ref, b3_ref,
                     out_ref):
    """3-layer MLP on one (TM, features) batch tile; weights resident in VMEM.

    Inputs/weights are bf16 (native MXU rate), accumulation + biases are f32,
    activations are re-narrowed to bf16 between layers.
    """
    x = w_ref[...]                                               # (TM, wd_p) bf16
    h = jnp.dot(x, w1_ref[...],
                preferred_element_type=jnp.float32) + b1_ref[...]
    h = jnp.maximum(h, 0.0).astype(jnp.bfloat16)                 # ReLU (VPU)
    h = jnp.dot(h, w2_ref[...],
                preferred_element_type=jnp.float32) + b2_ref[...]
    h = jnp.maximum(h, 0.0).astype(jnp.bfloat16)                 # ReLU (VPU)
    y = jnp.dot(h, w3_ref[...],
                preferred_element_type=jnp.float32) + b3_ref[...]
    out_ref[...] = y.astype(out_ref.dtype)                       # lane-dense store


def _pad2d(a, rows, cols, dtype):
    a = a.astype(dtype)
    return jnp.pad(a, ((0, rows - a.shape[0]), (0, cols - a.shape[1])))


def decoder_y_forward(w, params):
    """Pads to lane-dense shapes, tiles the batch, calls the Pallas kernel."""
    W1, b1, W2, b2, W3, b3 = params
    B, w_dim = w.shape
    hid_dim = W1.shape[1]
    y_dim = W3.shape[1]

    # Lane-dense feature dims (zero padding is mathematically inert here).
    wd_p = _round_up(w_dim, _LANE)
    hd_p = _round_up(hid_dim, _LANE)
    yd_p = _round_up(y_dim, _LANE)

    # ---- VMEM budget -------------------------------------------------------
    # bf16 weights counted twice (conservative for the non-Buffered fallback),
    # f32 biases, per-row streamed bytes = 2x bf16 in-tile + 2x f32 out-tile
    # (double buffered) + ~2x f32 live intermediate h.
    weight_bytes = 2 * (wd_p * hd_p + hd_p * hd_p + hd_p * yd_p)
    bias_bytes = 4 * (2 * hd_p + yd_p)
    resident_bytes = 2 * weight_bytes + 2 * bias_bytes
    per_row_bytes = 2 * wd_p * 2 + 2 * yd_p * 4 + 2 * hd_p * 4

    if resident_bytes + _TM_GRAN * per_row_bytes > _VMEM_BUDGET:
        # TODO(synk): for very large hid_dim, add an "arbitrary" hidden-dim
        # grid axis with an f32 VMEM accumulator + pl.when init/finalize
        # instead of keeping all three weight matrices resident.
        raise NotImplementedError(
            "DecoderY Pallas kernel assumes all three weight matrices fit "
            "resident in VMEM; hid_dim is too large for this path.")

    tm_fit = (_VMEM_BUDGET - resident_bytes) // per_row_bytes
    tm_cap = max(_TM_GRAN, min(_TM_CAP, (tm_fit // _TM_GRAN) * _TM_GRAN))

    # ---- batch tiling: minimize padding, keep >=2 steps for larger batches --
    n_tiles = _cdiv(B, tm_cap)
    if n_tiles == 1 and B >= _SPLIT_MIN_B:
        n_tiles = 2                       # let both v7x TensorCores get work
    tm = _round_up(_cdiv(B, n_tiles), _TM_GRAN)
    Bp = n_tiles * tm

    # ---- pad operands (bf16 streamed/resident, f32 biases) ------------------
    wp = _pad2d(w, Bp, wd_p, jnp.bfloat16)
    W1p = _pad2d(W1, wd_p, hd_p, jnp.bfloat16)
    W2p = _pad2d(W2, hd_p, hd_p, jnp.bfloat16)
    W3p = _pad2d(W3, hd_p, yd_p, jnp.bfloat16)
    b1p = _pad2d(b1, 1, hd_p, jnp.float32)
    b2p = _pad2d(b2, 1, hd_p, jnp.float32)
    b3p = _pad2d(b3, 1, yd_p, jnp.float32)

    # Request only what is needed (plus headroom); never v7x's full 64 MiB.
    needed = resident_bytes + tm * per_row_bytes
    vmem_limit = int(min(max(needed * 1.5 + (2 << 20), 16 << 20),
                         _VMEM_LIMIT_CAP))

    flops = 2 * B * (w_dim * hid_dim + hid_dim * hid_dim + hid_dim * y_dim)
    bytes_accessed = (2 * (B * w_dim + w_dim * hid_dim + hid_dim * hid_dim
                           + hid_dim * y_dim)
                      + 4 * (B * y_dim + 2 * hid_dim + y_dim))

    def build(weight_mode):
        def const_spec(shape):
            # Weights/biases never change block index.
            if weight_mode is None:
                return pl.BlockSpec(shape, lambda i: (0, 0))
            return pl.BlockSpec(shape, lambda i: (0, 0),
                                pipeline_mode=weight_mode)

        return pl.pallas_call(
            decoder_y_kernel,
            out_shape=jax.ShapeDtypeStruct((Bp, yd_p), jnp.float32),
            grid_spec=pltpu.PrefetchScalarGridSpec(
                num_scalar_prefetch=0,
                grid=(Bp // tm,),
                in_specs=[
                    pl.BlockSpec((tm, wd_p), lambda i: (i, 0)),  # streamed batch
                    const_spec((wd_p, hd_p)),                    # W1 resident
                    const_spec((1, hd_p)),                       # b1 resident
                    const_spec((hd_p, hd_p)),                    # W2 resident
                    const_spec((1, hd_p)),                       # b2 resident
                    const_spec((hd_p, yd_p)),                    # W3 resident
                    const_spec((1, yd_p)),                       # b3 resident
                ],
                out_specs=pl.BlockSpec((tm, yd_p), lambda i: (i, 0)),
            ),
            compiler_params=pltpu.CompilerParams(
                dimension_semantics=("parallel",),   # shard batch across TCs
                vmem_limit_bytes=vmem_limit,
            ),
            cost_estimate=pl.CostEstimate(
                flops=flops, transcendentals=0,
                bytes_accessed=bytes_accessed),
        )

    args = (wp, W1p, b1p, W2p, b2p, W3p, b3p)
    try:
        # Single-buffer the never-changing weight/bias blocks (halves their
        # VMEM footprint; no pipelining benefit lost).
        out = build(pl.Buffered(1))(*args)
    except Exception:
        # Older JAX without pipeline_mode plumbing: default double-buffering
        # is correct, just uses 2x weight VMEM (already budgeted for above).
        out = build(None)(*args)

    # Strip batch and lane padding to recover the exact module output.
    return out[:B, :y_dim]


def init_decoder_y_params(key, y_dim, hid_dim, w_dim):
    """Deterministic init mirroring nn.Linear default (U[-1/sqrt(fan_in), +])."""
    def linear(k, fan_in, fan_out):
        kw, kb = jax.random.split(k)
        bound = 1.0 / jnp.sqrt(jnp.float32(fan_in))
        W = jax.random.uniform(kw, (fan_in, fan_out), jnp.float32,
                               -bound, bound)
        b = jax.random.uniform(kb, (1, fan_out), jnp.float32, -bound, bound)
        return W, b

    k1, k2, k3 = jax.random.split(key, 3)
    W1, b1 = linear(k1, w_dim, hid_dim)
    W2, b2 = linear(k2, hid_dim, hid_dim)
    W3, b3 = linear(k3, hid_dim, y_dim)
    return (W1, b1, W2, b2, W3, b3)


def decoder_y_reference(w, params):
    """Pure-JAX f32 reference for correctness checking."""
    W1, b1, W2, b2, W3, b3 = params
    h = jnp.maximum(w @ W1 + b1, 0.0)
    h = jnp.maximum(h @ W2 + b2, 0.0)
    return h @ W3 + b3


if __name__ == "__main__":
    # Small shapes consistent with DecoderY(y_dim, hid_dim, w_dim).
    batch, y_dim, hid_dim, w_dim = 8, 3, 32, 4

    key = jax.random.PRNGKey(0)
    k_params, k_input = jax.random.split(key)

    params = init_decoder_y_params(k_params, y_dim, hid_dim, w_dim)
    w = jax.random.normal(k_input, (batch, w_dim), jnp.float32)

    y_recon = jax.block_until_ready(decoder_y_forward(w, params))
    y_ref = decoder_y_reference(w, params)

    assert y_recon.shape == (batch, y_dim)
    # bf16 streamed inputs/weights -> tolerance loosened vs. the f32 reference.
    max_err = float(jnp.max(jnp.abs(y_recon - y_ref)))
    assert jnp.allclose(y_recon, y_ref, atol=5e-2, rtol=5e-2), max_err

    print("KERNEL_OK")
</pallas_src>

<mosaic_0001>
module attributes {stable_mosaic.version = 11 : i64} {
  func.func @decoder_y_kernel(%arg0: i32, %arg1: memref<16x128xbf16, #tpu.memory_space<vmem>>, %arg2: memref<128x128xbf16, #tpu.memory_space<vmem>>, %arg3: memref<1x128xf32, #tpu.memory_space<vmem>>, %arg4: memref<128x128xbf16, #tpu.memory_space<vmem>>, %arg5: memref<1x128xf32, #tpu.memory_space<vmem>>, %arg6: memref<128x128xbf16, #tpu.memory_space<vmem>>, %arg7: memref<1x128xf32, #tpu.memory_space<vmem>>, %arg8: memref<16x128xf32, #tpu.memory_space<vmem>>) attributes {dimension_semantics = [#tpu.dimension_semantics<parallel>], iteration_bounds = array<i64: 1>, scalar_prefetch = 0 : i64, scratch_operands = 0 : i64, tpu.core_type = #tpu.core_type<tc>, window_params = [{transform_indices = @transform_0, window_bounds = array<i64: 16, 128>}, {pipeline_mode = #tpu.pipeline_mode<synchronous>, transform_indices = @transform_1, window_bounds = array<i64: 128, 128>}, {pipeline_mode = #tpu.pipeline_mode<synchronous>, transform_indices = @transform_2, window_bounds = array<i64: 1, 128>}, {pipeline_mode = #tpu.pipeline_mode<synchronous>, transform_indices = @transform_3, window_bounds = array<i64: 128, 128>}, {pipeline_mode = #tpu.pipeline_mode<synchronous>, transform_indices = @transform_4, window_bounds = array<i64: 1, 128>}, {pipeline_mode = #tpu.pipeline_mode<synchronous>, transform_indices = @transform_5, window_bounds = array<i64: 128, 128>}, {pipeline_mode = #tpu.pipeline_mode<synchronous>, transform_indices = @transform_6, window_bounds = array<i64: 1, 128>}, {transform_indices = @transform_7, window_bounds = array<i64: 16, 128>}]} {
    %c0 = arith.constant 0 : index
    %c0_0 = arith.constant 0 : index
    %0 = vector.load %arg1[%c0, %c0_0] : memref<16x128xbf16, #tpu.memory_space<vmem>>, vector<16x128xbf16>
    %c0_1 = arith.constant 0 : index
    %c0_2 = arith.constant 0 : index
    %1 = vector.load %arg2[%c0_1, %c0_2] : memref<128x128xbf16, #tpu.memory_space<vmem>>, vector<128x128xbf16>
    %cst = arith.constant dense<0.000000e+00> : vector<16x128xf32>
    %2 = tpu.matmul %0, %1, %cst {dimension_numbers = #tpu.dot_dimension_numbers<[1], [0], [0], [1], [0, 0, 1, 1], [], []>} : vector<16x128xbf16>, vector<128x128xbf16>, vector<16x128xf32> -> vector<16x128xf32>
    %c0_3 = arith.constant 0 : index
    %c0_4 = arith.constant 0 : index
    %3 = vector.load %arg3[%c0_3, %c0_4] : memref<1x128xf32, #tpu.memory_space<vmem>>, vector<1x128xf32>
    %4 = vector.broadcast %3 : vector<1x128xf32> to vector<16x128xf32>
    %5 = arith.addf %2, %4 : vector<16x128xf32>
    %cst_5 = arith.constant 0.000000e+00 : f32
    %6 = vector.broadcast %cst_5 : f32 to vector<16x128xf32>
    %7 = arith.maximumf %5, %6 : vector<16x128xf32>
    %8 = arith.truncf %7 : vector<16x128xf32> to vector<16x128xbf16>
    %c0_6 = arith.constant 0 : index
    %c0_7 = arith.constant 0 : index
    %9 = vector.load %arg4[%c0_6, %c0_7] : memref<128x128xbf16, #tpu.memory_space<vmem>>, vector<128x128xbf16>
    %cst_8 = arith.constant dense<0.000000e+00> : vector<16x128xf32>
    %10 = tpu.matmul %8, %9, %cst_8 {dimension_numbers = #tpu.dot_dimension_numbers<[1], [0], [0], [1], [0, 0, 1, 1], [], []>} : vector<16x128xbf16>, vector<128x128xbf16>, vector<16x128xf32> -> vector<16x128xf32>
    %c0_9 = arith.constant 0 : index
    %c0_10 = arith.constant 0 : index
    %11 = vector.load %arg5[%c0_9, %c0_10] : memref<1x128xf32, #tpu.memory_space<vmem>>, vector<1x128xf32>
    %12 = vector.broadcast %11 : vector<1x128xf32> to vector<16x128xf32>
    %13 = arith.addf %10, %12 : vector<16x128xf32>
    %cst_11 = arith.constant 0.000000e+00 : f32
    %14 = vector.broadcast %cst_11 : f32 to vector<16x128xf32>
    %15 = arith.maximumf %13, %14 : vector<16x128xf32>
    %16 = arith.truncf %15 : vector<16x128xf32> to vector<16x128xbf16>
    %c0_12 = arith.constant 0 : index
    %c0_13 = arith.constant 0 : index
    %17 = vector.load %arg6[%c0_12, %c0_13] : memref<128x128xbf16, #tpu.memory_space<vmem>>, vector<128x128xbf16>
    %cst_14 = arith.constant dense<0.000000e+00> : vector<16x128xf32>
    %18 = tpu.matmul %16, %17, %cst_14 {dimension_numbers = #tpu.dot_dimension_numbers<[1], [0], [0], [1], [0, 0, 1, 1], [], []>} : vector<16x128xbf16>, vector<128x128xbf16>, vector<16x128xf32> -> vector<16x128xf32>
    %c0_15 = arith.constant 0 : index
    %c0_16 = arith.constant 0 : index
    %19 = vector.load %arg7[%c0_15, %c0_16] : memref<1x128xf32, #tpu.memory_space<vmem>>, vector<1x128xf32>
    %20 = vector.broadcast %19 : vector<1x128xf32> to vector<16x128xf32>
    %21 = arith.addf %18, %20 : vector<16x128xf32>
    %c0_17 = arith.constant 0 : index
    %c0_18 = arith.constant 0 : index
    %22 = vector.load %arg8[%c0_17, %c0_18] : memref<16x128xf32, #tpu.memory_space<vmem>>, vector<16x128xf32>
    tpu.vector_store %arg8[%c0_17, %c0_18], %21 {strides = array<i32>} : memref<16x128xf32, #tpu.memory_space<vmem>>, vector<16x128xf32>,
    return
  }
  func.func @transform_0(%arg0: i32) -> (i32, i32) {
    %c0_i32 = arith.constant 0 : i32
    %c0_i32_0 = arith.constant 0 : i32
    return %arg0, %c0_i32 : i32, i32
  }
  func.func @transform_1(%arg0: i32) -> (i32, i32) {
    %c0_i32 = arith.constant 0 : i32
    %c0_i32_0 = arith.constant 0 : i32
    %c0_i32_1 = arith.constant 0 : i32
    return %c0_i32, %c0_i32_0 : i32, i32
  }
  func.func @transform_2(%arg0: i32) -> (i32, i32) {
    %c0_i32 = arith.constant 0 : i32
    %c0_i32_0 = arith.constant 0 : i32
    %c0_i32_1 = arith.constant 0 : i32
    return %c0_i32, %c0_i32_0 : i32, i32
  }
  func.func @transform_3(%arg0: i32) -> (i32, i32) {
    %c0_i32 = arith.constant 0 : i32
    %c0_i32_0 = arith.constant 0 : i32
    %c0_i32_1 = arith.constant 0 : i32
    return %c0_i32, %c0_i32_0 : i32, i32
  }
  func.func @transform_4(%arg0: i32) -> (i32, i32) {
    %c0_i32 = arith.constant 0 : i32
    %c0_i32_0 = arith.constant 0 : i32
    %c0_i32_1 = arith.constant 0 : i32
    return %c0_i32, %c0_i32_0 : i32, i32
  }
  func.func @transform_5(%arg0: i32) -> (i32, i32) {
    %c0_i32 = arith.constant 0 : i32
    %c0_i32_0 = arith.constant 0 : i32
    %c0_i32_1 = arith.constant 0 : i32
    return %c0_i32, %c0_i32_0 : i32, i32
  }
  func.func @transform_6(%arg0: i32) -> (i32, i32) {
    %c0_i32 = arith.constant 0 : i32
    %c0_i32_0 = arith.constant 0 : i32
    %c0_i32_1 = arith.constant 0 : i32
    return %c0_i32, %c0_i32_0 : i32, i32
  }
  func.func @transform_7(%arg0: i32) -> (i32, i32) {
    %c0_i32 = arith.constant 0 : i32
    %c0_i32_0 = arith.constant 0 : i32
    return %arg0, %c0_i32 : i32, i32
  }
}

module attributes {stable_mosaic.version = 11 : i64} {
  func.func @decoder_y_kernel(%arg0: i32, %arg1: memref<16x128xbf16, #tpu.memory_space<vmem>>, %arg2: memref<128x128xbf16, #tpu.memory_space<vmem>>, %arg3: memref<1x128xf32, #tpu.memory_space<vmem>>, %arg4: memref<128x128xbf16, #tpu.memory_space<vmem>>, %arg5: memref<1x128xf32, #tpu.memory_space<vmem>>, %arg6: memref<128x128xbf16, #tpu.memory_space<vmem>>, %arg7: memref<1x128xf32, #tpu.memory_space<vmem>>, %arg8: memref<16x128xf32, #tpu.memory_space<vmem>>) attributes {dimension_semantics = [#tpu.dimension_semantics<parallel>], iteration_bounds = array<i64: 1>, scalar_prefetch = 0 : i64, scratch_operands = 0 : i64, tpu.core_type = #tpu.core_type<tc>, window_params = [{transform_indices = @transform_0, window_bounds = array<i64: 16, 128>}, {pipeline_mode = #tpu.pipeline_mode<synchronous>, transform_indices = @transform_1, window_bounds = array<i64: 128, 128>}, {pipeline_mode = #tpu.pipeline_mode<synchronous>, transform_indices = @transform_2, window_bounds = array<i64: 1, 128>}, {pipeline_mode = #tpu.pipeline_mode<synchronous>, transform_indices = @transform_3, window_bounds = array<i64: 128, 128>}, {pipeline_mode = #tpu.pipeline_mode<synchronous>, transform_indices = @transform_4, window_bounds = array<i64: 1, 128>}, {pipeline_mode = #tpu.pipeline_mode<synchronous>, transform_indices = @transform_5, window_bounds = array<i64: 128, 128>}, {pipeline_mode = #tpu.pipeline_mode<synchronous>, transform_indices = @transform_6, window_bounds = array<i64: 1, 128>}, {transform_indices = @transform_7, window_bounds = array<i64: 16, 128>}]} {
    %c0 = arith.constant 0 : index
    %c0_0 = arith.constant 0 : index
    %0 = vector.load %arg1[%c0, %c0_0] : memref<16x128xbf16, #tpu.memory_space<vmem>>, vector<16x128xbf16>
    %c0_1 = arith.constant 0 : index
    %c0_2 = arith.constant 0 : index
    %1 = vector.load %arg2[%c0_1, %c0_2] : memref<128x128xbf16, #tpu.memory_space<vmem>>, vector<128x128xbf16>
    %cst = arith.constant dense<0.000000e+00> : vector<16x128xf32>
    %2 = tpu.matmul %0, %1, %cst {dimension_numbers = #tpu.dot_dimension_numbers<[1], [0], [0], [1], [0, 0, 1, 1], [], []>} : vector<16x128xbf16>, vector<128x128xbf16>, vector<16x128xf32> -> vector<16x128xf32>
    %c0_3 = arith.constant 0 : index
    %c0_4 = arith.constant 0 : index
    %3 = vector.load %arg3[%c0_3, %c0_4] : memref<1x128xf32, #tpu.memory_space<vmem>>, vector<1x128xf32>
    %4 = vector.broadcast %3 : vector<1x128xf32> to vector<16x128xf32>
    %5 = arith.addf %2, %4 : vector<16x128xf32>
    %cst_5 = arith.constant 0.000000e+00 : f32
    %6 = vector.broadcast %cst_5 : f32 to vector<16x128xf32>
    %7 = arith.maximumf %5, %6 : vector<16x128xf32>
    %8 = arith.truncf %7 : vector<16x128xf32> to vector<16x128xbf16>
    %c0_6 = arith.constant 0 : index
    %c0_7 = arith.constant 0 : index
    %9 = vector.load %arg4[%c0_6, %c0_7] : memref<128x128xbf16, #tpu.memory_space<vmem>>, vector<128x128xbf16>
    %cst_8 = arith.constant dense<0.000000e+00> : vector<16x128xf32>
    %10 = tpu.matmul %8, %9, %cst_8 {dimension_numbers = #tpu.dot_dimension_numbers<[1], [0], [0], [1], [0, 0, 1, 1], [], []>} : vector<16x128xbf16>, vector<128x128xbf16>, vector<16x128xf32> -> vector<16x128xf32>
    %c0_9 = arith.constant 0 : index
    %c0_10 = arith.constant 0 : index
    %11 = vector.load %arg5[%c0_9, %c0_10] : memref<1x128xf32, #tpu.memory_space<vmem>>, vector<1x128xf32>
    %12 = vector.broadcast %11 : vector<1x128xf32> to vector<16x128xf32>
    %13 = arith.addf %10, %12 : vector<16x128xf32>
    %cst_11 = arith.constant 0.000000e+00 : f32
    %14 = vector.broadcast %cst_11 : f32 to vector<16x128xf32>
    %15 = arith.maximumf %13, %14 : vector<16x128xf32>
    %16 = arith.truncf %15 : vector<16x128xf32> to vector<16x128xbf16>
    %c0_12 = arith.constant 0 : index
    %c0_13 = arith.constant 0 : index
    %17 = vector.load %arg6[%c0_12, %c0_13] : memref<128x128xbf16, #tpu.memory_space<vmem>>, vector<128x128xbf16>
    %cst_14 = arith.constant dense<0.000000e+00> : vector<16x128xf32>
    %18 = tpu.matmul %16, %17, %cst_14 {dimension_numbers = #tpu.dot_dimension_numbers<[1], [0], [0], [1], [0, 0, 1, 1], [], []>} : vector<16x128xbf16>, vector<128x128xbf16>, vector<16x128xf32> -> vector<16x128xf32>
    %c0_15 = arith.constant 0 : index
    %c0_16 = arith.constant 0 : index
    %19 = vector.load %arg7[%c0_15, %c0_16] : memref<1x128xf32, #tpu.memory_space<vmem>>, vector<1x128xf32>
    %20 = vector.broadcast %19 : vector<1x128xf32> to vector<16x128xf32>
    %21 = arith.addf %18, %20 : vector<16x128xf32>
    %c0_17 = arith.constant 0 : index
    %c0_18 = arith.constant 0 : index
    %22 = vector.load %arg8[%c0_17, %c0_18] : memref<16x128xf32, #tpu.memory_space<vmem>>, vector<16x128xf32>
    tpu.vector_store %arg8[%c0_17, %c0_18], %21 {strides = array<i32>} : memref<16x128xf32, #tpu.memory_space<vmem>>, vector<16x128xf32>,
    return
  }
  func.func @transform_0(%arg0: i32) -> (i32, i32) {
    %c0_i32 = arith.constant 0 : i32
    %c0_i32_0 = arith.constant 0 : i32
    return %arg0, %c0_i32 : i32, i32
  }
  func.func @transform_1(%arg0: i32) -> (i32, i32) {
    %c0_i32 = arith.constant 0 : i32
    %c0_i32_0 = arith.constant 0 : i32
    %c0_i32_1 = arith.constant 0 : i32
    return %c0_i32, %c0_i32_0 : i32, i32
  }
  func.func @transform_2(%arg0: i32) -> (i32, i32) {
    %c0_i32 = arith.constant 0 : i32
    %c0_i32_0 = arith.constant 0 : i32
    %c0_i32_1 = arith.constant 0 : i32
    return %c0_i32, %c0_i32_0 : i32, i32
  }
  func.func @transform_3(%arg0: i32) -> (i32, i32) {
    %c0_i32 = arith.constant 0 : i32
    %c0_i32_0 = arith.constant 0 : i32
    %c0_i32_1 = arith.constant 0 : i32
    return %c0_i32, %c0_i32_0 : i32, i32
  }
  func.func @transform_4(%arg0: i32) -> (i32, i32) {
    %c0_i32 = arith.constant 0 : i32
    %c0_i32_0 = arith.constant 0 : i32
    %c0_i32_1 = arith.constant 0 : i32
    return %c0_i32, %c0_i32_0 : i32, i32
  }
  func.func @transform_5(%arg0: i32) -> (i32, i32) {
    %c0_i32 = arith.constant 0 : i32
    %c0_i32_0 = arith.constant 0 : i32
    %c0_i32_1 = arith.constant 0 : i32
    return %c0_i32, %c0_i32_0 : i32, i32
  }
  func.func @transform_6(%arg0: i32) -> (i32, i32) {
    %c0_i32 = arith.constant 0 : i32
    %c0_i32_0 = arith.constant 0 : i32
    %c0_i32_1 = arith.constant 0 : i32
    return %c0_i32, %c0_i32_0 : i32, i32
  }
  func.func @transform_7(%arg0: i32) -> (i32, i32) {
    %c0_i32 = arith.constant 0 : i32
    %c0_i32_0 = arith.constant 0 : i32
    return %arg0, %c0_i32 : i32, i32
  }
}

</mosaic_0001>

<bundles_post_ra>
// kernel: tpu_custom_call.1
= control target key start
LH: loop header
LB: loop body
LE: loop exit
PB: predicated region body
PF: predicated region fallthrough
CT: control target
= control target key end

     0   :  { %12 = vsyncpa [#allocation3], 0  ;;  %s711_s0 = inlined_call_operand.hbm [shape: bf16[16,128], index: 0, kind: input, shape index: {}]   ;;  %s712_s1 = inlined_call_operand.hbm [shape: bf16[128,128], index: 1, kind: input, shape index: {}]   ;;  %s713_s2 = inlined_call_operand.vmem [shape: f32[1,128], index: 2, kind: input, shape index: {}]   ;;  %s714_s3 = inlined_call_operand.hbm [shape: bf16[128,128], index: 3, kind: input, shape index: {}]   ;;  %s715_s4 = inlined_call_operand.vmem [shape: f32[1,128], index: 4, kind: input, shape index: {}]   ;;  %s716_s5 = inlined_call_operand.hbm [shape: bf16[128,128], index: 5, kind: input, shape index: {}]   ;;  %s717_s6 = inlined_call_operand.vmem [shape: f32[1,128], index: 6, kind: input, shape index: {}]   ;;  %s718_s7 = inlined_call_operand.hbm [shape: f32[16,128], index: 7, kind: output, shape index: {}]  }
   0x1   :  { %13 = vsyncpa [#allocation6], 0 }
   0x2   :  { %14 = vsyncpa [#allocation9], 0 }
   0x3   :  { %15 = vsyncpa [#allocation4], 0  ;;  %s33_s26 = sshll.u32 %s712_s1, 4  ;;  %s638_s27 = smov [#allocation5]   ;;  %s34_s26 = int_to_ptr.hbm [resolvable:$true] %s33_s26 }
   0x4   :  { %s35_s28 = sshll.u32 %s638_s27, 4  ;;  %s20_s8 = sshll.u32 %s711_s0, 4  ;;  %s36_s28 = int_to_ptr.vmem [resolvable:$true] %s35_s28  ;;  %s21_s8 = int_to_ptr.hbm [resolvable:$true] %s20_s8 }
   0x5   :  { %s639_s9 = smov 64   ;;  %s640_s10 = smov 4  }
   0x6   :  { %41 = dma.hbm_to_vmem [thread:$0]  %s34_s26, 1024, %s36_s28, [#allocation6], %s639_s9, %s639_s9, %s640_s10  }
   0x7   :  { %s641_s11 = smov [#allocation2]   ;;  %s48_s15 = sshll.u32 %s714_s3, 4  ;;  %s49_s15 = int_to_ptr.hbm [resolvable:$true] %s48_s15 }
   0x8   :  { %s22_s12 = sshll.u32 %s641_s11, 4  ;;  %s63_s17 = sshll.u32 %s716_s5, 4  ;;  %s23_s12 = int_to_ptr.vmem [resolvable:$true] %s22_s12  ;;  %s64_s17 = int_to_ptr.hbm [resolvable:$true] %s63_s17 }
   0x9   :  { %28 = dma.hbm_to_vmem [thread:$0]  %s21_s8, 128, %s23_s12, [#allocation3], %s639_s9, %s639_s9, %s640_s10  }
   0xa   :  { %s642_s18 = smov [#allocation7]   ;;  %s643_s0 = smov [#allocation8]  }
   0xb   :  { %s50_s19 = sshll.u32 %s642_s18, 4  ;;  %s65_s20 = sshll.u32 %s643_s0, 4  ;;  %s51_s19 = int_to_ptr.vmem [resolvable:$true] %s50_s19  ;;  %s66_s20 = int_to_ptr.vmem [resolvable:$true] %s65_s20 }
   0xc   :  { %56 = dma.hbm_to_vmem [thread:$0]  %s49_s15, 1024, %s51_s19, [#allocation6], %s639_s9, %s639_s9, %s640_s10  }
   0xd   :  { %71 = dma.hbm_to_vmem [thread:$0]  %s64_s17, 1024, %s66_s20, [#allocation9], %s639_s9, %s639_s9, %s640_s10  }
   0xe   :  { %630 = dma.done.wait [#allocation3], 128  }
   0xf   :  { %631 = vsyncadd [#allocation3], 4294967168 }
  0x10   :  { %632 = dma.done.wait [#allocation6], 2048  }
  0x11   :  { %633 = vsyncadd [#allocation6], 4294965248 }
  0x12   :  { %634 = dma.done.wait [#allocation9], 1024  }
  0x13   :  { %635 = vsyncadd [#allocation9], 4294966272  ;;  %v481_v0 = vld [vmem:[#allocation5 + $0x38] sm:$0xff]  ;;  %v480_v1 = vld [vmem:[#allocation5 + $0x30] sm:$0xff]  ;;  %s644_s24 = smov [#allocation10]   ;;  %s645_s28 = smov 128  }
  0x14   :  { %166 = vmatpush.bf16.msra.mxu0 %v481_v0  ;;  %v489_v2 = vld [vmem:[#allocation7 + $0x38] sm:$0xff]  ;;  %v488_v3 = vld [vmem:[#allocation7 + $0x30] sm:$0xff]  ;;  %v479_v4 = vld [vmem:[#allocation5 + $0x28] sm:$0xff]  ;;  %s356_s25 = sshll.u32 %s644_s24, 4  ;;  %s646_s29 = smov 8   ;;  %s357_s25 = int_to_ptr.vmem [resolvable:$true] %s356_s25 }
  0x15   :  { %251 = vmatpush.bf16.msra.mxu1 %v489_v2  ;;  %v487_v5 = vld [vmem:[#allocation7 + $0x28] sm:$0xff]  ;;  %v478_v6 = vld [vmem:[#allocation5 + $0x20] sm:$0xff]  ;;  %v477_v8 = vld [vmem:[#allocation5 + $0x18] sm:$0xff] }
  0x16   :  { %v486_v7 = vld [vmem:[#allocation7 + $0x20] sm:$0xff]  ;;  %v476_v9 = vld [vmem:[#allocation5 + $0x10] sm:$0xff]  ;;  %v475_v10 = vld [vmem:[#allocation5 + $0x8] sm:$0xff] }
  0x17   :  { %v474_v11 = vld [vmem:[#allocation5] sm:$0xff]  ;;  %v473_v12 = vld [vmem:[#allocation2] sm:$0xff]  ;;  %v484_v14 = vld [vmem:[#allocation7 + $0x10] sm:$0xff] }
  0x18   :  { %167 = vmatpush.bf16.msra.mxu0 %v480_v1  ;;  %v485_v13 = vld [vmem:[#allocation7 + $0x18] sm:$0xff]  ;;  %v483_v15 = vld [vmem:[#allocation7 + $0x8] sm:$0xff]  ;;  %v482_v16 = vld [vmem:[#allocation7] sm:$0xff] }
  0x19   :  { %252 = vmatpush.bf16.msra.mxu1 %v488_v3  ;;  %v497_v17 = vld [vmem:[#allocation8 + $0x38] sm:$0xff]  ;;  %v496_v18 = vld [vmem:[#allocation8 + $0x30] sm:$0xff]  ;;  %v495_v19 = vld [vmem:[#allocation8 + $0x28] sm:$0xff] }
  0x1a   :  { %336 = vmatpush.bf16.msra.mxu2 %v497_v17  ;;  %v494_v20 = vld [vmem:[#allocation8 + $0x20] sm:$0xff]  ;;  %v507_v22 = vld [vmem:[%s713_s2] ss:$0 sm:$0xff]  ;;  %v492_v30 = vld [vmem:[#allocation8 + $0x10] sm:$0xff] }
  0x1b   :  { %v493_v29 = vld [vmem:[#allocation8 + $0x18] sm:$0xff]  ;;  %v491_v31 = vld [vmem:[#allocation8 + $0x8] sm:$0xff]  ;;  %v490_v32 = vld [vmem:[#allocation8] sm:$0xff] }
  0x1c   :  { %168 = vmatpush.bf16.msra.mxu0 %v479_v4  ;;  %v508_v34 = vld [vmem:[%s715_s4] ss:$0 sm:$0xff]  ;;  %s358_s4 = sshll.u32 %s718_s7, 4  ;;  %s359_s4 = int_to_ptr.hbm [resolvable:$true] %s358_s4 }
  0x1d   :  { %253 = vmatpush.bf16.msra.mxu1 %v487_v5  ;;  %v509_v41 = vld [vmem:[%s717_s6] ss:$0 sm:$0xff] }
  0x1e   :  { %337 = vmatpush.bf16.msra.mxu2 %v496_v18 }
  0x20   :  { %169 = vmatpush.bf16.msra.mxu0 %v478_v6 }
  0x21   :  { %254 = vmatpush.bf16.msra.mxu1 %v486_v7 }
  0x22   :  { %338 = vmatpush.bf16.msra.mxu2 %v495_v19 }
  0x24   :  { %170 = vmatpush.bf16.msra.mxu0 %v477_v8 }
  0x25   :  { %255 = vmatpush.bf16.msra.mxu1 %v485_v13 }
  0x26   :  { %339 = vmatpush.bf16.msra.mxu2 %v494_v20 }
  0x28   :  { %171 = vmatpush.bf16.msra.mxu0 %v476_v9 }
  0x29   :  { %256 = vmatpush.bf16.msra.mxu1 %v484_v14 }
  0x2a   :  { %340 = vmatpush.bf16.msra.mxu2 %v493_v29 }
  0x2c   :  { %172 = vmatpush.bf16.msra.mxu0 %v475_v10 }
  0x2d   :  { %257 = vmatpush.bf16.msra.mxu1 %v483_v15 }
  0x2e   :  { %341 = vmatpush.bf16.msra.mxu2 %v492_v30 }
  0x30   :  { %173 = vmatpush.bf16.msra.mxu0 %v474_v11 }
  0x31   :  { %258 = vmatpush.bf16.msra.mxu1 %v482_v16 }
  0x32   :  { %342 = vmatpush.bf16.msra.mxu2 %v491_v31 }
  0x33   :  { %174 = vmatmul.bf16.vlgmr.msra.gmra.mxu0 %v473_v12 }
  0x36   :  { %343 = vmatpush.bf16.msra.mxu2 %v490_v32 }
  0xb0   :  { %v175_v21 = vpop.f32.mrf.mxu0 }
  0xb1   :  { %v176_v23 = vadd.f32 %v507_v22, %v175_v21 }
  0xb3   :  { %v180_v26 = vmax.f32 %v176_v23, 0.0 }
  0xb8   :  { %v177_v24 = vpop.f32.mrf.mxu0 }
  0xb9   :  { %v178_v25 = vadd.f32 %v507_v22, %v177_v24 }
  0xbb   :  { %v181_v27 = vmax.f32 %v178_v25, 0.0 }
  0xbd   :  { %v182_v28 = vpack.c.bf16 %v181_v27, %v180_v26 }
  0xbf   :  { %259 = vmatmul.bf16.vlgmr.msra.gmra.mxu1 %v182_v28 }
 0x13c   :  { %v260_v33 = vpop.f32.mrf.mxu1 }
 0x13d   :  { %v261_v35 = vadd.f32 %v508_v34, %v260_v33 }
 0x13f   :  { %v265_v38 = vmax.f32 %v261_v35, 0.0 }
 0x144   :  { %v262_v36 = vpop.f32.mrf.mxu1 }
 0x145   :  { %v263_v37 = vadd.f32 %v508_v34, %v262_v36 }
 0x147   :  { %v266_v39 = vmax.f32 %v263_v37, 0.0 }
 0x149   :  { %v267_v40 = vpack.c.bf16 %v266_v39, %v265_v38 }
 0x14b   :  { %344 = vmatmul.bf16.vlgmr.msra.gmra.mxu2 %v267_v40 }
 0x1ce   :  { %v345_v42 = vpop.f32.mrf.mxu2 }
 0x1cf   :  { %v346_v43 = vadd.f32 %v509_v41, %v345_v42 }
 0x1d1   :  { %350 = vst [vmem:[#allocation10] sm:$0xff] %v346_v43 }
 0x1d6   :  { %v347_v44 = vpop.f32.mrf.mxu2 }
 0x1d7   :  { %v348_v45 = vadd.f32 %v509_v41, %v347_v44 }
 0x1d9   :  { %351 = vst [vmem:[#allocation10 + $0x8] sm:$0xff] %v348_v45 }
 0x1da   :  { %364 = dma.vmem_to_hbm [thread:$0]  %s357_s25, 256, %s359_s4, [#allocation4], %s645_s28, %s645_s28, %s646_s29  }
 0x1db   :  { %636 = dma.done.wait [#allocation4], 256  }
 0x1dc   :  { %637 = vsyncadd [#allocation4], 4294967040 }
 0x1dd   :  { %369 = vsyncpa [#allocation3], 1 }
 0x1de   :  { %370 = vsyncpa [#allocation6], 1 }
 0x1df   :  { %371 = vsyncpa [#allocation9], 1 }
 0x1e0   :  { %372 = vsyncpa [#allocation4], 1 }

// kernel: tpu_custom_call.1
= control target key start
LH: loop header
LB: loop body
LE: loop exit
PB: predicated region body
PF: predicated region fallthrough
CT: control target
= control target key end

     0   :  { %12 = vsyncpa [#allocation3], 0  ;;  %s711_s0 = inlined_call_operand.hbm [shape: bf16[16,128], index: 0, kind: input, shape index: {}]   ;;  %s712_s1 = inlined_call_operand.hbm [shape: bf16[128,128], index: 1, kind: input, shape index: {}]   ;;  %s713_s2 = inlined_call_operand.vmem [shape: f32[1,128], index: 2, kind: input, shape index: {}]   ;;  %s714_s3 = inlined_call_operand.hbm [shape: bf16[128,128], index: 3, kind: input, shape index: {}]   ;;  %s715_s4 = inlined_call_operand.vmem [shape: f32[1,128], index: 4, kind: input, shape index: {}]   ;;  %s716_s5 = inlined_call_operand.hbm [shape: bf16[128,128], index: 5, kind: input, shape index: {}]   ;;  %s717_s6 = inlined_call_operand.vmem [shape: f32[1,128], index: 6, kind: input, shape index: {}]   ;;  %s718_s7 = inlined_call_operand.hbm [shape: f32[16,128], index: 7, kind: output, shape index: {}]  }
   0x1   :  { %13 = vsyncpa [#allocation6], 0 }
   0x2   :  { %14 = vsyncpa [#allocation9], 0 }
   0x3   :  { %15 = vsyncpa [#allocation4], 0  ;;  %s33_s26 = sshll.u32 %s712_s1, 4  ;;  %s638_s27 = smov [#allocation5]   ;;  %s34_s26 = int_to_ptr.hbm [resolvable:$true] %s33_s26 }
   0x4   :  { %s35_s28 = sshll.u32 %s638_s27, 4  ;;  %s20_s8 = sshll.u32 %s711_s0, 4  ;;  %s36_s28 = int_to_ptr.vmem [resolvable:$true] %s35_s28  ;;  %s21_s8 = int_to_ptr.hbm [resolvable:$true] %s20_s8 }
   0x5   :  { %s639_s9 = smov 64   ;;  %s640_s10 = smov 4  }
   0x6   :  { %41 = dma.hbm_to_vmem [thread:$0]  %s34_s26, 1024, %s36_s28, [#allocation6], %s639_s9, %s639_s9, %s640_s10  }
   0x7   :  { %s641_s11 = smov [#allocation2]   ;;  %s48_s15 = sshll.u32 %s714_s3, 4  ;;  %s49_s15 = int_to_ptr.hbm [resolvable:$true] %s48_s15 }
   0x8   :  { %s22_s12 = sshll.u32 %s641_s11, 4  ;;  %s63_s17 = sshll.u32 %s716_s5, 4  ;;  %s23_s12 = int_to_ptr.vmem [resolvable:$true] %s22_s12  ;;  %s64_s17 = int_to_ptr.hbm [resolvable:$true] %s63_s17 }
   0x9   :  { %28 = dma.hbm_to_vmem [thread:$0]  %s21_s8, 128, %s23_s12, [#allocation3], %s639_s9, %s639_s9, %s640_s10  }
   0xa   :  { %s642_s18 = smov [#allocation7]   ;;  %s643_s0 = smov [#allocation8]  }
   0xb   :  { %s50_s19 = sshll.u32 %s642_s18, 4  ;;  %s65_s20 = sshll.u32 %s643_s0, 4  ;;  %s51_s19 = int_to_ptr.vmem [resolvable:$true] %s50_s19  ;;  %s66_s20 = int_to_ptr.vmem [resolvable:$true] %s65_s20 }
   0xc   :  { %56 = dma.hbm_to_vmem [thread:$0]  %s49_s15, 1024, %s51_s19, [#allocation6], %s639_s9, %s639_s9, %s640_s10  }
   0xd   :  { %71 = dma.hbm_to_vmem [thread:$0]  %s64_s17, 1024, %s66_s20, [#allocation9], %s639_s9, %s639_s9, %s640_s10  }
   0xe   :  { %630 = dma.done.wait [#allocation3], 128  }
   0xf   :  { %631 = vsyncadd [#allocation3], 4294967168 }
  0x10   :  { %632 = dma.done.wait [#allocation6], 2048  }
  0x11   :  { %633 = vsyncadd [#allocation6], 4294965248 }
  0x12   :  { %634 = dma.done.wait [#allocation9], 1024  }
  0x13   :  { %635 = vsyncadd [#allocation9], 4294966272  ;;  %v481_v0 = vld [vmem:[#allocation5 + $0x38] sm:$0xff]  ;;  %v480_v1 = vld [vmem:[#allocation5 + $0x30] sm:$0xff]  ;;  %s644_s24 = smov [#allocation10]   ;;  %s645_s28 = smov 128  }
  0x14   :  { %166 = vmatpush.bf16.msra.mxu0 %v481_v0  ;;  %v489_v2 = vld [vmem:[#allocation7 + $0x38] sm:$0xff]  ;;  %v488_v3 = vld [vmem:[#allocation7 + $0x30] sm:$0xff]  ;;  %v479_v4 = vld [vmem:[#allocation5 + $0x28] sm:$0xff]  ;;  %s356_s25 = sshll.u32 %s644_s24, 4  ;;  %s646_s29 = smov 8   ;;  %s357_s25 = int_to_ptr.vmem [resolvable:$true] %s356_s25 }
  0x15   :  { %251 = vmatpush.bf16.msra.mxu1 %v489_v2  ;;  %v487_v5 = vld [vmem:[#allocation7 + $0x28] sm:$0xff]  ;;  %v478_v6 = vld [vmem:[#allocation5 + $0x20] sm:$0xff]  ;;  %v477_v8 = vld [vmem:[#allocation5 + $0x18] sm:$0xff] }
  0x16   :  { %v486_v7 = vld [vmem:[#allocation7 + $0x20] sm:$0xff]  ;;  %v476_v9 = vld [vmem:[#allocation5 + $0x10] sm:$0xff]  ;;  %v475_v10 = vld [vmem:[#allocation5 + $0x8] sm:$0xff] }
  0x17   :  { %v474_v11 = vld [vmem:[#allocation5] sm:$0xff]  ;;  %v473_v12 = vld [vmem:[#allocation2] sm:$0xff]  ;;  %v484_v14 = vld [vmem:[#allocation7 + $0x10] sm:$0xff] }
  0x18   :  { %167 = vmatpush.bf16.msra.mxu0 %v480_v1  ;;  %v485_v13 = vld [vmem:[#allocation7 + $0x18] sm:$0xff]  ;;  %v483_v15 = vld [vmem:[#allocation7 + $0x8] sm:$0xff]  ;;  %v482_v16 = vld [vmem:[#allocation7] sm:$0xff] }
  0x19   :  { %252 = vmatpush.bf16.msra.mxu1 %v488_v3  ;;  %v497_v17 = vld [vmem:[#allocation8 + $0x38] sm:$0xff]  ;;  %v496_v18 = vld [vmem:[#allocation8 + $0x30] sm:$0xff]  ;;  %v495_v19 = vld [vmem:[#allocation8 + $0x28] sm:$0xff] }
  0x1a   :  { %336 = vmatpush.bf16.msra.mxu2 %v497_v17  ;;  %v494_v20 = vld [vmem:[#allocation8 + $0x20] sm:$0xff]  ;;  %v507_v22 = vld [vmem:[%s713_s2] ss:$0 sm:$0xff]  ;;  %v492_v30 = vld [vmem:[#allocation8 + $0x10] sm:$0xff] }
  0x1b   :  { %v493_v29 = vld [vmem:[#allocation8 + $0x18] sm:$0xff]  ;;  %v491_v31 = vld [vmem:[#allocation8 + $0x8] sm:$0xff]  ;;  %v490_v32 = vld [vmem:[#allocation8] sm:$0xff] }
  0x1c   :  { %168 = vmatpush.bf16.msra.mxu0 %v479_v4  ;;  %v508_v34 = vld [vmem:[%s715_s4] ss:$0 sm:$0xff]  ;;  %s358_s4 = sshll.u32 %s718_s7, 4  ;;  %s359_s4 = int_to_ptr.hbm [resolvable:$true] %s358_s4 }
  0x1d   :  { %253 = vmatpush.bf16.msra.mxu1 %v487_v5  ;;  %v509_v41 = vld [vmem:[%s717_s6] ss:$0 sm:$0xff] }
  0x1e   :  { %337 = vmatpush.bf16.msra.mxu2 %v496_v18 }
  0x20   :  { %169 = vmatpush.bf16.msra.mxu0 %v478_v6 }
  0x21   :  { %254 = vmatpush.bf16.msra.mxu1 %v486_v7 }
  0x22   :  { %338 = vmatpush.bf16.msra.mxu2 %v495_v19 }
  0x24   :  { %170 = vmatpush.bf16.msra.mxu0 %v477_v8 }
  0x25   :  { %255 = vmatpush.bf16.msra.mxu1 %v485_v13 }
  0x26   :  { %339 = vmatpush.bf16.msra.mxu2 %v494_v20 }
  0x28   :  { %171 = vmatpush.bf16.msra.mxu0 %v476_v9 }
  0x29   :  { %256 = vmatpush.bf16.msra.mxu1 %v484_v14 }
  0x2a   :  { %340 = vmatpush.bf16.msra.mxu2 %v493_v29 }
  0x2c   :  { %172 = vmatpush.bf16.msra.mxu0 %v475_v10 }
  0x2d   :  { %257 = vmatpush.bf16.msra.mxu1 %v483_v15 }
  0x2e   :  { %341 = vmatpush.bf16.msra.mxu2 %v492_v30 }
  0x30   :  { %173 = vmatpush.bf16.msra.mxu0 %v474_v11 }
  0x31   :  { %258 = vmatpush.bf16.msra.mxu1 %v482_v16 }
  0x32   :  { %342 = vmatpush.bf16.msra.mxu2 %v491_v31 }
  0x33   :  { %174 = vmatmul.bf16.vlgmr.msra.gmra.mxu0 %v473_v12 }
  0x36   :  { %343 = vmatpush.bf16.msra.mxu2 %v490_v32 }
  0xb0   :  { %v175_v21 = vpop.f32.mrf.mxu0 }
  0xb1   :  { %v176_v23 = vadd.f32 %v507_v22, %v175_v21 }
  0xb3   :  { %v180_v26 = vmax.f32 %v176_v23, 0.0 }
  0xb8   :  { %v177_v24 = vpop.f32.mrf.mxu0 }
  0xb9   :  { %v178_v25 = vadd.f32 %v507_v22, %v177_v24 }
  0xbb   :  { %v181_v27 = vmax.f32 %v178_v25, 0.0 }
  0xbd   :  { %v182_v28 = vpack.c.bf16 %v181_v27, %v180_v26 }
  0xbf   :  { %259 = vmatmul.bf16.vlgmr.msra.gmra.mxu1 %v182_v28 }
 0x13c   :  { %v260_v33 = vpop.f32.mrf.mxu1 }
 0x13d   :  { %v261_v35 = vadd.f32 %v508_v34, %v260_v33 }
 0x13f   :  { %v265_v38 = vmax.f32 %v261_v35, 0.0 }
 0x144   :  { %v262_v36 = vpop.f32.mrf.mxu1 }
 0x145   :  { %v263_v37 = vadd.f32 %v508_v34, %v262_v36 }
 0x147   :  { %v266_v39 = vmax.f32 %v263_v37, 0.0 }
 0x149   :  { %v267_v40 = vpack.c.bf16 %v266_v39, %v265_v38 }
 0x14b   :  { %344 = vmatmul.bf16.vlgmr.msra.gmra.mxu2 %v267_v40 }
 0x1ce   :  { %v345_v42 = vpop.f32.mrf.mxu2 }
 0x1cf   :  { %v346_v43 = vadd.f32 %v509_v41, %v345_v42 }
 0x1d1   :  { %350 = vst [vmem:[#allocation10] sm:$0xff] %v346_v43 }
 0x1d6   :  { %v347_v44 = vpop.f32.mrf.mxu2 }
 0x1d7   :  { %v348_v45 = vadd.f32 %v509_v41, %v347_v44 }
 0x1d9   :  { %351 = vst [vmem:[#allocation10 + $0x8] sm:$0xff] %v348_v45 }
 0x1da   :  { %364 = dma.vmem_to_hbm [thread:$0]  %s357_s25, 256, %s359_s4, [#allocation4], %s645_s28, %s645_s28, %s646_s29  }
 0x1db   :  { %636 = dma.done.wait [#allocation4], 256  }
 0x1dc   :  { %637 = vsyncadd [#allocation4], 4294967040 }
 0x1dd   :  { %369 = vsyncpa [#allocation3], 1 }
 0x1de   :  { %370 = vsyncpa [#allocation6], 1 }
 0x1df   :  { %371 = vsyncpa [#allocation9], 1 }
 0x1e0   :  { %372 = vsyncpa [#allocation4], 1 }

</bundles_post_ra>
